<compile_context>
chip_gen: v7x
topology: tpu7x:2x2x1
jax: 0.10.0
libtpu: 0.0.40
codegen_flags: <defaults>
</compile_context>

<pallas_src>
import functools

import jax
import jax.numpy as jnp
from jax.experimental import pallas as pl
from jax.experimental.pallas import tpu as pltpu

D_IN = 1 * 28 * 28      # 784
HIDDEN = 28
NUM_CLASSES = 10
H_PAD = 128             # lane-padded hidden dim
C_PAD = 128             # lane-padded class dim


def _round_up(x, m):
    return (x + m - 1) // m * m


def mlp_kernel(x_ref, w1_ref, b1_ref, w2_ref, b2_ref, out_ref, *, num_classes):
    # x_ref:  (TB, 784)  bf16        w1_ref: (784, 128) bf16   b1_ref: (1, 128) f32
    # w2_ref: (128, 128) f32         b2_ref: (1, 128)   f32
    # out_ref:(TB, 128)  f32  (columns >= num_classes are padding, sliced off in wrapper)
    x = x_ref[...]

    # fc1 + ReLU (MXU matmul, f32 accumulation)
    h = jnp.dot(x, w1_ref[...], preferred_element_type=jnp.float32) + b1_ref[...]
    h = jnp.maximum(h, 0.0)

    # fc2
    logits = jnp.dot(h, w2_ref[...], preferred_element_type=jnp.float32) + b2_ref[...]

    # Exclude padded class lanes from the softmax reductions.
    col = jax.lax.broadcasted_iota(jnp.int32, logits.shape, dimension=1)
    logits = jnp.where(col < num_classes, logits, jnp.float32(-1e30))

    # Numerically stable log_softmax along the last dim.
    m = jnp.max(logits, axis=-1, keepdims=True)
    shifted = logits - m
    lse = jnp.log(jnp.sum(jnp.exp(shifted), axis=-1, keepdims=True))
    out_ref[...] = (shifted - lse).astype(out_ref.dtype)


def imagenet_forward(x_nchw, w1, b1, w2, b2, *, tile_b=1024):
    """x_nchw: (B, 1, 28, 28). w1: (784, 28), b1: (28,), w2: (28, 10), b2: (10,).

    Weights are stored transposed (in, out), i.e. the kernel computes x @ W + b,
    equivalent to PyTorch's x @ W.T + b. Returns (B, 10) f32 log-probs.
    """
    B = x_nchw.shape[0]

    # Flatten (same semantics as torch .view(B, 784)); stream x as bf16.
    x = x_nchw.reshape(B, D_IN).astype(jnp.bfloat16)

    # Adaptive batch tile: big for big batches, never bigger than the padded batch.
    tile = min(tile_b, _round_up(B, 16))
    tile = _round_up(tile, 16)                 # bf16 sublane packing
    B_pad = _round_up(B, tile)
    if B_pad != B:
        x = jnp.pad(x, ((0, B_pad - B), (0, 0)))

    # Lane-pad parameters (zero padding; padded hidden units are inert, padded class
    # lanes are masked inside the kernel).
    w1p = jnp.zeros((D_IN, H_PAD), jnp.float32).at[:, :HIDDEN].set(
        w1.astype(jnp.float32)).astype(jnp.bfloat16)
    b1p = jnp.zeros((1, H_PAD), jnp.float32).at[:, :HIDDEN].set(
        b1.reshape(1, HIDDEN).astype(jnp.float32))
    w2p = jnp.zeros((H_PAD, C_PAD), jnp.float32).at[:HIDDEN, :NUM_CLASSES].set(
        w2.astype(jnp.float32))
    b2p = jnp.zeros((1, C_PAD), jnp.float32).at[:, :NUM_CLASSES].set(
        b2.reshape(1, NUM_CLASSES).astype(jnp.float32))

    grid = (B_pad // tile,)

    cost = pl.CostEstimate(
        flops=2 * B_pad * D_IN * H_PAD + 2 * B_pad * H_PAD * C_PAD,
        transcendentals=B_pad * C_PAD + B_pad,
        bytes_accessed=(B_pad * D_IN * 2 + D_IN * H_PAD * 2
                        + H_PAD * C_PAD * 4 + B_pad * C_PAD * 4),
    )

    out_padded = pl.pallas_call(
        functools.partial(mlp_kernel, num_classes=NUM_CLASSES),
        out_shape=jax.ShapeDtypeStruct((B_pad, C_PAD), jnp.float32),
        grid_spec=pltpu.PrefetchScalarGridSpec(
            num_scalar_prefetch=0,
            grid=grid,
            in_specs=[
                pl.BlockSpec((tile, D_IN), lambda i: (i, 0)),    # x tile (streamed)
                pl.BlockSpec((D_IN, H_PAD), lambda i: (0, 0)),   # W1 (VMEM-resident)
                pl.BlockSpec((1, H_PAD), lambda i: (0, 0)),      # b1
                pl.BlockSpec((H_PAD, C_PAD), lambda i: (0, 0)),  # W2
                pl.BlockSpec((1, C_PAD), lambda i: (0, 0)),      # b2
            ],
            out_specs=pl.BlockSpec((tile, C_PAD), lambda i: (i, 0)),
        ),
        compiler_params=pltpu.CompilerParams(
            dimension_semantics=("parallel",),
            vmem_limit_bytes=64 * 1024 * 1024,
        ),
        cost_estimate=cost,
    )(x, w1p, b1p, w2p, b2p)

    # Slice away batch padding and padded class lanes.
    return out_padded[:B, :NUM_CLASSES]


def init_params(key):
    """Deterministic init mimicking PyTorch nn.Linear default U(-1/sqrt(fan_in), ...)."""
    k1, k2, k3, k4 = jax.random.split(key, 4)
    lim1 = 1.0 / jnp.sqrt(jnp.float32(D_IN))
    lim2 = 1.0 / jnp.sqrt(jnp.float32(HIDDEN))
    # Stored already transposed: (in, out)
    w1 = jax.random.uniform(k1, (D_IN, HIDDEN), jnp.float32, -lim1, lim1)
    b1 = jax.random.uniform(k2, (HIDDEN,), jnp.float32, -lim1, lim1)
    w2 = jax.random.uniform(k3, (HIDDEN, NUM_CLASSES), jnp.float32, -lim2, lim2)
    b2 = jax.random.uniform(k4, (NUM_CLASSES,), jnp.float32, -lim2, lim2)
    return w1, b1, w2, b2


if __name__ == "__main__":
    key = jax.random.PRNGKey(0)
    kx, kp = jax.random.split(key)

    B = 8
    x = jax.random.normal(kx, (B, 1, 28, 28), dtype=jnp.float32)
    w1, b1, w2, b2 = init_params(kp)

    out = imagenet_forward(x, w1, b1, w2, b2)
    out = jax.block_until_ready(out)
    assert out.shape == (B, NUM_CLASSES)

    xf = x.reshape(B, D_IN)

    # Tight check vs a reference using the same bf16 input streaming as the kernel.
    h_bf = jnp.maximum(
        jnp.dot(xf.astype(jnp.bfloat16), w1.astype(jnp.bfloat16),
                preferred_element_type=jnp.float32) + b1, 0.0)
    ref_bf = jax.nn.log_softmax(h_bf @ w2 + b2, axis=-1)
    assert jnp.allclose(out, ref_bf, atol=2e-3, rtol=2e-3), "mismatch vs bf16 reference"

    # Loose check vs the full-f32 PyTorch-equivalent reference (bf16 streaming error only).
    h = jnp.maximum(xf @ w1 + b1, 0.0)
    ref = jax.nn.log_softmax(h @ w2 + b2, axis=-1)
    assert jnp.allclose(out, ref, atol=5e-2, rtol=0.0), "mismatch vs f32 reference"

    print("KERNEL_OK")
</pallas_src>

<mosaic_0001>
module attributes {stable_mosaic.version = 11 : i64} {
  func.func @mlp_kernel(%arg0: i32, %arg1: memref<16x784xbf16, #tpu.memory_space<vmem>>, %arg2: memref<784x128xbf16, #tpu.memory_space<vmem>>, %arg3: memref<1x128xf32, #tpu.memory_space<vmem>>, %arg4: memref<128x128xf32, #tpu.memory_space<vmem>>, %arg5: memref<1x128xf32, #tpu.memory_space<vmem>>, %arg6: memref<16x128xf32, #tpu.memory_space<vmem>>) attributes {dimension_semantics = [#tpu.dimension_semantics<parallel>], iteration_bounds = array<i64: 1>, scalar_prefetch = 0 : i64, scratch_operands = 0 : i64, tpu.core_type = #tpu.core_type<tc>, window_params = [{transform_indices = @transform_0, window_bounds = array<i64: 16, 784>}, {pipeline_mode = #tpu.pipeline_mode<synchronous>, transform_indices = @transform_1, window_bounds = array<i64: 784, 128>}, {pipeline_mode = #tpu.pipeline_mode<synchronous>, transform_indices = @transform_2, window_bounds = array<i64: 1, 128>}, {pipeline_mode = #tpu.pipeline_mode<synchronous>, transform_indices = @transform_3, window_bounds = array<i64: 128, 128>}, {pipeline_mode = #tpu.pipeline_mode<synchronous>, transform_indices = @transform_4, window_bounds = array<i64: 1, 128>}, {transform_indices = @transform_5, window_bounds = array<i64: 16, 128>}]} {
    %c0 = arith.constant 0 : index
    %c0_0 = arith.constant 0 : index
    %0 = vector.load %arg1[%c0, %c0_0] : memref<16x784xbf16, #tpu.memory_space<vmem>>, vector<16x784xbf16>
    %c0_1 = arith.constant 0 : index
    %c0_2 = arith.constant 0 : index
    %1 = vector.load %arg2[%c0_1, %c0_2] : memref<784x128xbf16, #tpu.memory_space<vmem>>, vector<784x128xbf16>
    %cst = arith.constant dense<0.000000e+00> : vector<16x128xf32>
    %2 = tpu.matmul %0, %1, %cst {dimension_numbers = #tpu.dot_dimension_numbers<[1], [0], [0], [1], [0, 0, 1, 1], [], []>} : vector<16x784xbf16>, vector<784x128xbf16>, vector<16x128xf32> -> vector<16x128xf32>
    %c0_3 = arith.constant 0 : index
    %c0_4 = arith.constant 0 : index
    %3 = vector.load %arg3[%c0_3, %c0_4] : memref<1x128xf32, #tpu.memory_space<vmem>>, vector<1x128xf32>
    %4 = vector.broadcast %3 : vector<1x128xf32> to vector<16x128xf32>
    %5 = arith.addf %2, %4 : vector<16x128xf32>
    %cst_5 = arith.constant 0.000000e+00 : f32
    %6 = vector.broadcast %cst_5 : f32 to vector<16x128xf32>
    %7 = arith.maximumf %5, %6 : vector<16x128xf32>
    %c0_6 = arith.constant 0 : index
    %c0_7 = arith.constant 0 : index
    %8 = vector.load %arg4[%c0_6, %c0_7] : memref<128x128xf32, #tpu.memory_space<vmem>>, vector<128x128xf32>
    %cst_8 = arith.constant dense<0.000000e+00> : vector<16x128xf32>
    %9 = tpu.matmul %7, %8, %cst_8 {dimension_numbers = #tpu.dot_dimension_numbers<[1], [0], [0], [1], [0, 0, 1, 1], [], []>} : vector<16x128xf32>, vector<128x128xf32>, vector<16x128xf32> -> vector<16x128xf32>
    %c0_9 = arith.constant 0 : index
    %c0_10 = arith.constant 0 : index
    %10 = vector.load %arg5[%c0_9, %c0_10] : memref<1x128xf32, #tpu.memory_space<vmem>>, vector<1x128xf32>
    %11 = vector.broadcast %10 : vector<1x128xf32> to vector<16x128xf32>
    %12 = arith.addf %9, %11 : vector<16x128xf32>
    %13 = tpu.iota {dimensions = array<i32: 1>} : vector<16x128xi32>
    %c10_i32 = arith.constant 10 : i32
    %14 = vector.broadcast %c10_i32 : i32 to vector<16x128xi32>
    %15 = arith.cmpi slt, %13, %14 : vector<16x128xi32>
    %cst_11 = arith.constant -1.000000e+30 : f32
    %16 = vector.broadcast %cst_11 : f32 to vector<16x128xf32>
    %17 = arith.select %15, %12, %16 : vector<16x128xi1>, vector<16x128xf32>
    %cst_12 = arith.constant dense<0xFF800000> : vector<16xf32>
    %18 = vector.multi_reduction <maximumf>, %17, %cst_12 [1] : vector<16x128xf32> to vector<16xf32>
    %19 = vector.shape_cast %18 : vector<16xf32> to vector<16x1xf32>
    %20 = vector.broadcast %19 : vector<16x1xf32> to vector<16x128xf32>
    %21 = arith.subf %17, %20 : vector<16x128xf32>
    %22 = math.exp %21 : vector<16x128xf32>
    %cst_13 = arith.constant dense<0.000000e+00> : vector<16xf32>
    %23 = vector.multi_reduction <add>, %22, %cst_13 [1] : vector<16x128xf32> to vector<16xf32>
    %24 = vector.shape_cast %23 : vector<16xf32> to vector<16x1xf32>
    %25 = math.log %24 : vector<16x1xf32>
    %26 = vector.broadcast %25 : vector<16x1xf32> to vector<16x128xf32>
    %27 = arith.subf %21, %26 : vector<16x128xf32>
    %c0_14 = arith.constant 0 : index
    %c0_15 = arith.constant 0 : index
    %28 = vector.load %arg6[%c0_14, %c0_15] : memref<16x128xf32, #tpu.memory_space<vmem>>, vector<16x128xf32>
    tpu.vector_store %arg6[%c0_14, %c0_15], %27 {strides = array<i32>} : memref<16x128xf32, #tpu.memory_space<vmem>>, vector<16x128xf32>,
    return
  }
  func.func @transform_0(%arg0: i32) -> (i32, i32) {
    %c0_i32 = arith.constant 0 : i32
    %c0_i32_0 = arith.constant 0 : i32
    return %arg0, %c0_i32 : i32, i32
  }
  func.func @transform_1(%arg0: i32) -> (i32, i32) {
    %c0_i32 = arith.constant 0 : i32
    %c0_i32_0 = arith.constant 0 : i32
    %c0_i32_1 = arith.constant 0 : i32
    return %c0_i32, %c0_i32_0 : i32, i32
  }
  func.func @transform_2(%arg0: i32) -> (i32, i32) {
    %c0_i32 = arith.constant 0 : i32
    %c0_i32_0 = arith.constant 0 : i32
    %c0_i32_1 = arith.constant 0 : i32
    return %c0_i32, %c0_i32_0 : i32, i32
  }
  func.func @transform_3(%arg0: i32) -> (i32, i32) {
    %c0_i32 = arith.constant 0 : i32
    %c0_i32_0 = arith.constant 0 : i32
    %c0_i32_1 = arith.constant 0 : i32
    return %c0_i32, %c0_i32_0 : i32, i32
  }
  func.func @transform_4(%arg0: i32) -> (i32, i32) {
    %c0_i32 = arith.constant 0 : i32
    %c0_i32_0 = arith.constant 0 : i32
    %c0_i32_1 = arith.constant 0 : i32
    return %c0_i32, %c0_i32_0 : i32, i32
  }
  func.func @transform_5(%arg0: i32) -> (i32, i32) {
    %c0_i32 = arith.constant 0 : i32
    %c0_i32_0 = arith.constant 0 : i32
    return %arg0, %c0_i32 : i32, i32
  }
}

</mosaic_0001>

<bundles_post_ra>
// kernel: tpu_custom_call.1
= control target key start
LH: loop header
LB: loop body
LE: loop exit
PB: predicated region body
PF: predicated region fallthrough
CT: control target
= control target key end

     0   :  { %10 = vsyncpa [#allocation3], 0  ;;  %s1403_s0 = inlined_call_operand.hbm [shape: bf16[16,784], index: 0, kind: input, shape index: {}]   ;;  %s1404_s1 = inlined_call_operand.hbm [shape: bf16[784,128], index: 1, kind: input, shape index: {}]   ;;  %s1405_s2 = inlined_call_operand.hbm [shape: f32[1,128], index: 2, kind: input, shape index: {}]   ;;  %s1406_s3 = inlined_call_operand.hbm [shape: f32[128,128], index: 3, kind: input, shape index: {}]   ;;  %s1407_s4 = inlined_call_operand.hbm [shape: f32[1,128], index: 4, kind: input, shape index: {}]   ;;  %s1408_s5 = inlined_call_operand.hbm [shape: f32[16,128], index: 5, kind: output, shape index: {}]  }
   0x1   :  { %11 = vsyncpa [#allocation6], 0 }
   0x2   :  { %12 = vsyncpa [#allocation9], 0 }
   0x3   :  { %13 = vsyncpa [#allocation4], 0  ;;  %s1281_s18 = smov [#allocation5]   ;;  %s1141_s22 = scalar_lea.hbm %s1404_s1, 6272 }
   0x4   :  { %s31_s19 = sshll.u32 %s1281_s18, 4  ;;  %p1142_p0 = scmp.ne.s32.totalorder %s1404_s1, %s1141_s22  ;;  %s32_s19 = int_to_ptr.vmem [resolvable:$true] %s31_s19 }
   0x5   :  { %p1145_p1 = scmp.lt.u32.totalorder %s1141_s22, %s1404_s1 }
   0x7   :  { %p1147_p2 = pnand %p1145_p1, %p1142_p0 }
   0x9   :  { %1150 = shalt.err (!%p1147_p2)
}
   0xa   :  { %s1151_s27 = scalar_lea.vmem %s32_s19, 6272  ;;  %p1156_p4 = scmp.lt.s32.totalorder %s32_s19, %s32_s19 }
   0xb   :  { %p1152_p3 = scmp.ne.s32.totalorder %s32_s19, %s1151_s27  ;;  %p1157_p5 = scmp.lt.s32.totalorder %s1151_s27, %s1151_s27 }
   0xd   :  { %p1158_p6 = por %p1157_p5, %p1156_p4 }
   0xf   :  { %p1159_p7 = pnand %p1158_p6, %p1152_p3 }
  0x11   :  { %1162 = shalt.err (!%p1159_p7)
}
  0x12   :  { %s1282_s28 = smov 64   ;;  %s1283_s29 = smov 4  }
  0x13   :  { %37 = dma.hbm_to_vmem [thread:$0]  %s1404_s1, 6272, %s32_s19, [#allocation6], %s1282_s28, %s1282_s28, %s1283_s29  }
  0x14   :  { %s1284_s7 = smov [#allocation8]   ;;  %s1163_s11 = scalar_lea.hbm %s1406_s3, 2048 }
  0x15   :  { %s53_s8 = sshll.u32 %s1284_s7, 4  ;;  %p1164_p8 = scmp.ne.s32.totalorder %s1406_s3, %s1163_s11  ;;  %s54_s8 = int_to_ptr.vmem [resolvable:$true] %s53_s8 }
  0x16   :  { %p1167_p9 = scmp.lt.u32.totalorder %s1163_s11, %s1406_s3 }
  0x18   :  { %p1169_p10 = pnand %p1167_p9, %p1164_p8 }
  0x1a   :  { %1172 = shalt.err (!%p1169_p10)
}
  0x1b   :  { %s1173_s16 = scalar_lea.vmem %s54_s8, 2048  ;;  %p1178_p12 = scmp.lt.s32.totalorder %s54_s8, %s54_s8 }
  0x1c   :  { %p1174_p11 = scmp.ne.s32.totalorder %s54_s8, %s1173_s16  ;;  %p1179_p13 = scmp.lt.s32.totalorder %s1173_s16, %s1173_s16 }
  0x1e   :  { %p1180_p0 = por %p1179_p13, %p1178_p12 }
  0x20   :  { %p1181_p1 = pnand %p1180_p0, %p1174_p11 }
  0x22   :  { %1184 = shalt.err (!%p1181_p1)
}
  0x23   :  { %s1285_s1 = smov 128   ;;  %s1286_s17 = smov 8  }
  0x24   :  { %59 = dma.hbm_to_vmem [thread:$0]  %s1406_s3, 2048, %s54_s8, [#allocation9], %s1285_s1, %s1285_s1, %s1286_s17  }
  0x25   :  { %s1287_s20 = smov [#allocation2]   ;;  %s1185_s24 = scalar_lea.hbm %s1403_s0, 896 }
  0x26   :  { %s19_s21 = sshll.u32 %s1287_s20, 4  ;;  %p1186_p2 = scmp.ne.s32.totalorder %s1403_s0, %s1185_s24  ;;  %s20_s21 = int_to_ptr.vmem [resolvable:$true] %s19_s21 }
  0x27   :  { %p1189_p3 = scmp.lt.u32.totalorder %s1185_s24, %s1403_s0 }
  0x29   :  { %p1191_p4 = pnand %p1189_p3, %p1186_p2 }
  0x2b   :  { %1194 = shalt.err (!%p1191_p4)
}
  0x2c   :  { %s1195_s29 = scalar_lea.vmem %s20_s21, 896  ;;  %p1200_p6 = scmp.lt.s32.totalorder %s20_s21, %s20_s21 }
  0x2d   :  { %p1196_p5 = scmp.ne.s32.totalorder %s20_s21, %s1195_s29  ;;  %p1201_p7 = scmp.lt.s32.totalorder %s1195_s29, %s1195_s29 }
  0x2f   :  { %p1202_p8 = por %p1201_p7, %p1200_p6 }
  0x31   :  { %p1203_p9 = pnand %p1202_p8, %p1196_p5 }
  0x33   :  { %1206 = shalt.err (!%p1203_p9)
}
  0x34   :  { %s1288_s3 = smov 448   ;;  %s1289_s30 = smov 28  }
  0x35   :  { %25 = dma.hbm_to_vmem [thread:$0]  %s1403_s0, 896, %s20_s21, [#allocation3], %s1288_s3, %s1288_s3, %s1289_s30  }
  0x36   :  { %s1290_s8 = smov [#allocation7]   ;;  %s1291_s10 = smov [#allocation10]  }
  0x37   :  { %s44_s9 = sshll.u32 %s1290_s8, 4  ;;  %s66_s11 = sshll.u32 %s1291_s10, 4  ;;  %s45_s9 = int_to_ptr.vmem [resolvable:$true] %s44_s9  ;;  %s67_s11 = int_to_ptr.vmem [resolvable:$true] %s66_s11 }
  0x38   :  { %s1207_s14 = scalar_lea.hbm %s1405_s2, 16 }
  0x39   :  { %p1208_p10 = scmp.ne.s32.totalorder %s1405_s2, %s1207_s14  ;;  %p1211_p11 = scmp.lt.u32.totalorder %s1207_s14, %s1405_s2 }
  0x3b   :  { %p1213_p12 = pnand %p1211_p11, %p1208_p10 }
  0x3d   :  { %1216 = shalt.err (!%p1213_p12)
}
  0x3e   :  { %s1217_s0 = scalar_lea.vmem %s45_s9, 16  ;;  %s1221_s20 = scalar_lea.vmem %s45_s9, 32 }
  0x3f   :  { %p1218_p13 = scmp.ne.s32.totalorder %s45_s9, %s1217_s0  ;;  %p1222_p0 = scmp.lt.s32.totalorder %s45_s9, %s45_s9 }
  0x40   :  { %p1223_p1 = scmp.lt.s32.totalorder %s1221_s20, %s1217_s0 }
  0x42   :  { %p1224_p2 = por %p1223_p1, %p1222_p0 }
  0x44   :  { %p1225_p3 = pnand %p1224_p2, %p1218_p13 }
  0x46   :  { %1228 = shalt.err (!%p1225_p3)
}
  0x47   :  { %47 = dma.hbm_to_vmem [thread:$0]  %s1405_s2, 16, %s45_s9, [#allocation6]  }
  0x48   :  { %s1229_s25 = scalar_lea.hbm %s1407_s4, 16 }
  0x49   :  { %p1230_p4 = scmp.ne.s32.totalorder %s1407_s4, %s1229_s25  ;;  %p1233_p5 = scmp.lt.u32.totalorder %s1229_s25, %s1407_s4 }
  0x4b   :  { %p1235_p6 = pnand %p1233_p5, %p1230_p4 }
  0x4d   :  { %1238 = shalt.err (!%p1235_p6)
}
  0x4e   :  { %s1239_s3 = scalar_lea.vmem %s67_s11, 16  ;;  %s1243_s30 = scalar_lea.vmem %s67_s11, 32 }
  0x4f   :  { %p1240_p7 = scmp.ne.s32.totalorder %s67_s11, %s1239_s3  ;;  %p1244_p8 = scmp.lt.s32.totalorder %s67_s11, %s67_s11 }
  0x50   :  { %p1245_p9 = scmp.lt.s32.totalorder %s1243_s30, %s1239_s3 }
  0x52   :  { %p1246_p10 = por %p1245_p9, %p1244_p8 }
  0x54   :  { %p1247_p11 = pnand %p1246_p10, %p1240_p7 }
  0x56   :  { %1250 = shalt.err (!%p1247_p11)
}
  0x57   :  { %69 = dma.hbm_to_vmem [thread:$0]  %s1407_s4, 16, %s67_s11, [#allocation9]  }
  0x58   :  { %1273 = dma.done.wait [#allocation3], 896  }
  0x59   :  { %1274 = vsyncadd [#allocation3], 4294966400 }
  0x5a   :  { %1275 = dma.done.wait [#allocation6], 6288  }
  0x5b   :  { %1276 = vsyncadd [#allocation6], 4294961008 }
  0x5c   :  { %1277 = dma.done.wait [#allocation9], 2064  }
  0x5d   :  { %1278 = vsyncadd [#allocation9], 4294965232  ;;  %v1074_v0 = vld [vmem:[#allocation5 + $0x40] sm:$0xff]   ;;  %v1078_v4 = vld [vmem:[#allocation5 + $0x48] sm:$0xff]   ;;  %v1292_v38 = vmov 0.0   ;;  %vm1293_vm0 = vmmov 0  }
  0x5e   :  { %v1075_v1 = vld [vmem:[#allocation5] sm:$0xff]   ;;  %901 = vmatprep.subr.bf16.mxu0 %v1074_v0  ;;  %v1079_v5 = vld [vmem:[#allocation5 + $0x8] sm:$0xff]   ;;  %v1082_v8 = vld [vmem:[#allocation5 + $0x50] sm:$0xff]   ;;  %vm528_vm1 = vcmask 130048   ;;  %s1294_s4 = smov [#allocation11]  }
  0x5f   :  { %v1076_v2 = vld [vmem:[#allocation5 + $0xc0] sm:$0xff]   ;;  %902 = vmatpush3.bf16.msra.mxu0 %v1075_v1  ;;  %v1080_v6 = vld [vmem:[#allocation5 + $0xc8] sm:$0xff]   ;;  %v1083_v9 = vld [vmem:[#allocation5 + $0x10] sm:$0xff]   ;;  %s828_s7 = sshll.u32 %s1294_s4, 4  ;;  %s829_s7 = int_to_ptr.vmem [resolvable:$true] %s828_s7 }
  0x60   :  { %v1077_v3 = vld [vmem:[#allocation5 + $0x80] sm:$0xff]   ;;  %923 = vmatprep.subr.bf16.mxu1 %v1076_v2  ;;  %903 = vmatprep.subr.bf16.mxu0 %v1078_v4  ;;  %v1081_v7 = vld [vmem:[#allocation5 + $0x88] sm:$0xff]   ;;  %v1084_v10 = vld [vmem:[#allocation5 + $0xd0] sm:$0xff]   ;;  %s1251_s8 = scalar_lea.vmem %s829_s7, 256  ;;  %p1256_p13 = scmp.lt.s32.totalorder %s829_s7, %s829_s7 }
  0x61   :  { %924 = vmatpush3.bf16.msra.mxu1 %v1077_v3  ;;  %v1085_v11 = vld [vmem:[#allocation5 + $0x90] sm:$0xff]   ;;  %v1086_v12 = vld [vmem:[#allocation5 + $0x58] sm:$0xff]   ;;  %v1090_v16 = vld [vmem:[#allocation5 + $0x60] sm:$0xff]   ;;  %p1252_p12 = scmp.ne.s32.totalorder %s829_s7, %s1251_s8  ;;  %p1257_p0 = scmp.lt.s32.totalorder %s1251_s8, %s1251_s8 }
  0x62   :  { %925 = vmatprep.subr.bf16.mxu1 %v1080_v6  ;;  %v1087_v13 = vld [vmem:[#allocation5 + $0x18] sm:$0xff]   ;;  %v1091_v17 = vld [vmem:[#allocation5 + $0x20] sm:$0xff]   ;;  %v1094_v20 = vld [vmem:[#allocation5 + $0x68] sm:$0xff]  }
  0x63   :  { %904 = vmatpush3.bf16.msra.mxu0 %v1079_v5  ;;  %v1088_v14 = vld [vmem:[#allocation5 + $0xd8] sm:$0xff]   ;;  %v1092_v18 = vld [vmem:[#allocation5 + $0xe0] sm:$0xff]   ;;  %v1095_v21 = vld [vmem:[#allocation5 + $0x28] sm:$0xff]   ;;  %p1258_p1 = por %p1257_p0, %p1256_p13 }
  0x64   :  { %905 = vmatprep.subr.bf16.mxu0 %v1082_v8  ;;  %v1089_v15 = vld [vmem:[#allocation5 + $0x98] sm:$0xff]   ;;  %v1093_v19 = vld [vmem:[#allocation5 + $0xa0] sm:$0xff]   ;;  %v1096_v22 = vld [vmem:[#allocation5 + $0xe8] sm:$0xff]  }
  0x65   :  { %926 = vmatpush3.bf16.msra.mxu1 %v1081_v7  ;;  %v1097_v23 = vld [vmem:[#allocation5 + $0xa8] sm:$0xff]   ;;  %v1098_v24 = vld [vmem:[#allocation5 + $0x70] sm:$0xff]   ;;  %v1102_v28 = vld [vmem:[#allocation5 + $0x78] sm:$0xff]   ;;  %p1259_p2 = pnand %p1258_p1, %p1252_p12 }
  0x66   :  { %927 = vmatprep.subr.bf16.mxu1 %v1084_v10  ;;  %v1099_v25 = vld [vmem:[#allocation5 + $0x30] sm:$0xff]   ;;  %v1103_v29 = vld [vmem:[#allocation5 + $0x38] sm:$0xff]   ;;  %v1105_v31 = vld [vmem:[#allocation2] ss:$28 sps:$4 sm:$0xff]  }
  0x67   :  { %906 = vmatpush3.bf16.msra.mxu0 %v1083_v9  ;;  %v1100_v26 = vld [vmem:[#allocation5 + $0xf0] sm:$0xff]   ;;  %v1104_v30 = vld [vmem:[#allocation5 + $0xf8] sm:$0xff]   ;;  %v1107_v32 = vld [vmem:[#allocation2 + $0x4] ss:$28 sps:$4 sm:$0xff]  }
  0x68   :  { %907 = vmatprep.subr.bf16.mxu0 %v1086_v12  ;;  %v1101_v27 = vld [vmem:[#allocation5 + $0xb0] sm:$0xff]   ;;  %v1108_v33 = vld [vmem:[#allocation5 + $0xb8] sm:$0xff]   ;;  %564 = vmatprep.mubr.bf16.mxu0 %v1107_v32  ;;  %v1109_v34 = vld [vmem:[#allocation5 + $0x140] sm:$0xff]  }
  0x69   :  { %928 = vmatpush3.bf16.msra.mxu1 %v1085_v11  ;;  %v1110_v35 = vld [vmem:[#allocation2 + $0x8] ss:$28 sps:$4 sm:$0xff]   ;;  %v1113_v37 = vld [vmem:[#allocation5 + $0x100] sm:$0xff]   ;;  %v1118_v43 = vld [vmem:[#allocation5 + $0x158] sm:$0xff]  }
  0x6a   :  { %929 = vmatprep.subr.bf16.mxu1 %v1088_v14  ;;  %v1112_v36 = vld [vmem:[#allocation2 + $0xc] ss:$28 sps:$4 sm:$0xff]   ;;  %v1114_v39 = vld [vmem:[#allocation5 + $0x148] sm:$0xff]   ;;  %v1119_v44 = vld [vmem:[#allocation5 + $0x118] sm:$0xff]  }
  0x6b   :  { %908 = vmatpush3.bf16.msra.mxu0 %v1087_v13  ;;  %605 = vmatprep.mubr.bf16.mxu1 %v1112_v36  ;;  %v1115_v40 = vld [vmem:[#allocation5 + $0x108] sm:$0xff]   ;;  %v1116_v41 = vld [vmem:[#allocation5 + $0x150] sm:$0xff]   ;;  %v1120_v45 = vld [vmem:[#allocation5 + $0x160] sm:$0xff]  }
  0x6c   :  { %909 = vmatprep.subr.bf16.mxu0 %v1090_v16  ;;  %v1117_v42 = vld [vmem:[#allocation5 + $0x110] sm:$0xff]   ;;  %v1121_v46 = vld [vmem:[#allocation5 + $0x120] sm:$0xff]   ;;  %v1122_v47 = vld [vmem:[#allocation5 + $0x168] sm:$0xff]  }
  0x6d   :  { %930 = vmatpush3.bf16.msra.mxu1 %v1089_v15  ;;  %v1128_v48 = vld [vmem:[#allocation5 + $0x180] sm:$0xff]   ;;  %v1131_v49 = vld [vmem:[#allocation2 + $0x14] ss:$28 sps:$4 sm:$0xff]   ;;  %v1123_v51 = vld [vmem:[#allocation5 + $0x128] sm:$0xff]  }
  0x6e   :  { %931 = vmatprep.subr.bf16.mxu1 %v1092_v18  ;;  %v1132_v50 = vld [vmem:[#allocation2 + $0x18] ss:$28 sps:$4 sm:$0xff]   ;;  %v1124_v52 = vld [vmem:[#allocation5 + $0x170] sm:$0xff]   ;;  %v842_v18 = vld [vmem:[#allocation7] ss:$0 sm:$0xff] }
  0x6f   :  { %910 = vmatpush3.bf16.msra.mxu0 %v1091_v17  ;;  %v1125_v53 = vld [vmem:[#allocation5 + $0x130] sm:$0xff]   ;;  %v1126_v54 = vld [vmem:[#allocation5 + $0x178] sm:$0xff]   ;;  %v701_v61 = vld [vmem:[#allocation8 + $0x18] sm:$0xff] }
  0x70   :  { %911 = vmatprep.subr.bf16.mxu0 %v1094_v20  ;;  %v1127_v55 = vld [vmem:[#allocation5 + $0x138] sm:$0xff]   ;;  %v698_v57 = vld [vmem:[#allocation8] sm:$0xff]  ;;  %v705_v3 = vld [vmem:[#allocation8 + $0x38] sm:$0xff] }
  0x71   :  { %932 = vmatpush3.bf16.msra.mxu1 %v1093_v19  ;;  %v1129_v56 = vld [vmem:[#allocation2 + $0x10] ss:$28 sps:$4 sm:$0xff]   ;;  %v702_v63 = vld [vmem:[#allocation8 + $0x20] sm:$0xff]  ;;  %v709_v9 = vld [vmem:[#allocation8 + $0x58] sm:$0xff] }
  0x72   :  { %933 = vmatprep.subr.bf16.mxu1 %v1096_v22  ;;  %v699_v58 = vld [vmem:[#allocation8 + $0x8] sm:$0xff]  ;;  %v700_v59 = vld [vmem:[#allocation8 + $0x10] sm:$0xff]  ;;  %v706_v5 = vld [vmem:[#allocation8 + $0x40] sm:$0xff] }
  0x73   :  { %912 = vmatpush3.bf16.msra.mxu0 %v1095_v21  ;;  %v1028_v60 = vpack.c.bf16 %v699_v58, %v698_v57  ;;  %v1032_v62 = vpack.c.bf16 %v701_v61, %v700_v59  ;;  %v703_v0 = vld [vmem:[#allocation8 + $0x28] sm:$0xff]  ;;  %v704_v2 = vld [vmem:[#allocation8 + $0x30] sm:$0xff]  ;;  %v710_v11 = vld [vmem:[#allocation8 + $0x60] sm:$0xff] }
  0x74   :  { %913 = vmatprep.subr.bf16.mxu0 %v1098_v24  ;;  %v1036_v1 = vpack.c.bf16 %v703_v0, %v702_v63  ;;  %v1040_v4 = vpack.c.bf16 %v705_v3, %v704_v2  ;;  %v707_v6 = vld [vmem:[#allocation8 + $0x48] sm:$0xff]  ;;  %v708_v8 = vld [vmem:[#allocation8 + $0x50] sm:$0xff]  ;;  %v713_v15 = vld [vmem:[#allocation8 + $0x78] sm:$0xff] }
  0x75   :  { %934 = vmatpush3.bf16.msra.mxu1 %v1097_v23  ;;  %v1044_v7 = vpack.c.bf16 %v707_v6, %v706_v5  ;;  %v1048_v10 = vpack.c.bf16 %v709_v9, %v708_v8  ;;  %v711_v12 = vld [vmem:[#allocation8 + $0x68] sm:$0xff]  ;;  %v712_v14 = vld [vmem:[#allocation8 + $0x70] sm:$0xff] }
  0x76   :  { %935 = vmatprep.subr.bf16.mxu1 %v1100_v26  ;;  %v1052_v13 = vpack.c.bf16 %v711_v12, %v710_v11  ;;  %v1056_v16 = vpack.c.bf16 %v713_v15, %v712_v14 }
  0x77   :  { %914 = vmatpush3.bf16.msra.mxu0 %v1099_v25 }
  0x78   :  { %915 = vmatprep.subr.bf16.mxu0 %v1102_v28 }
  0x79   :  { %936 = vmatpush3.bf16.msra.mxu1 %v1101_v27 }
  0x7a   :  { %937 = vmatprep.subr.bf16.mxu1 %v1104_v30 }
  0x7b   :  { %916 = vmatpush3.bf16.msra.mxu0 %v1103_v29 }
  0x7c   :  { %945 = vmatprep.subr.bf16.mxu0 %v1109_v34 }
  0x7d   :  { %938 = vmatpush3.bf16.msra.mxu1 %v1108_v33 }
  0x7e   :  { %565 = vmatmul.mubr.bf16.vlgmr.msra.gmra.mrb[0].mxu0 %v1105_v31  ;;  %987 = vmatprep.subr.bf16.mxu1 %v1292_v38 }
  0x7f   :  { %946 = vmatpush3.bf16.msra.mxu0 %v1113_v37  ;;  %646 = vmatprep.mubr.bf16.mxu0 %v1131_v49 }
  0x80   :  { %606 = vmatmul.mubr.bf16.vlgmr.msra.gmra.mrb[0].mxu1 %v1110_v35  ;;  %947 = vmatprep.subr.bf16.mxu0 %v1114_v39 }
  0x81   :  { %989 = vmatprep.mubr.msk.bf16.mxu1 %vm1293_vm0, %v1292_v38  ;;  %988 = vmatpush3.bf16.msra.mxu1 %v1128_v48 }
  0x82   :  { %1029 = vmatprep.subr.bf16.mxu1 %v1028_v60 }
  0x83   :  { %948 = vmatpush3.bf16.msra.mxu0 %v1115_v40 }
  0x84   :  { %949 = vmatprep.subr.bf16.mxu0 %v1116_v41 }
  0x87   :  { %950 = vmatpush3.bf16.msra.mxu0 %v1117_v42 }
  0x88   :  { %951 = vmatprep.subr.bf16.mxu0 %v1118_v43  ;;  %990 = vmatmul.mubr.msk.bf16.vlgmr.msra.gmra.mrb[4].mxu1 %vm528_vm1, %v1132_v50  ;;  %v796_v50 = vlaneseq }
  0x89   :  { %1031 = vmatpush3.bf16.msra.mxu1 %v1028_v60 }
  0x8a   :  { %1033 = vmatprep.subr.bf16.mxu1 %v1032_v62 }
  0x8b   :  { %952 = vmatpush3.bf16.msra.mxu0 %v1119_v44 }
  0x8c   :  { %953 = vmatprep.subr.bf16.mxu0 %v1120_v45 }
  0x8d   :  { %1035 = vmatpush3.bf16.msra.mxu1 %v1032_v62 }
  0x8e   :  { %1037 = vmatprep.subr.bf16.mxu1 %v1036_v1 }
  0x8f   :  { %954 = vmatpush3.bf16.msra.mxu0 %v1121_v46 }
  0x90   :  { %955 = vmatprep.subr.bf16.mxu0 %v1122_v47 }
  0x91   :  { %1039 = vmatpush3.bf16.msra.mxu1 %v1036_v1 }
  0x92   :  { %1041 = vmatprep.subr.bf16.mxu1 %v1040_v4 }
  0x93   :  { %956 = vmatpush3.bf16.msra.mxu0 %v1123_v51  ;;  %v797_v51 = vand.u32 127, %v796_v50 }
  0x94   :  { %957 = vmatprep.subr.bf16.mxu0 %v1124_v52  ;;  %v900_v52 = vld [vmem:[#allocation10] ss:$0 sm:$0xff] }
  0x95   :  { %1043 = vmatpush3.bf16.msra.mxu1 %v1040_v4  ;;  %vm798_vm2 = vcmp.lt.s32.totalorder %v797_v51, 10 }
  0x96   :  { %1045 = vmatprep.subr.bf16.mxu1 %v1044_v7 }
  0x97   :  { %958 = vmatpush3.bf16.msra.mxu0 %v1125_v53 }
  0x98   :  { %959 = vmatprep.subr.bf16.mxu0 %v1126_v54 }
  0x99   :  { %1047 = vmatpush3.bf16.msra.mxu1 %v1044_v7 }
  0x9a   :  { %1049 = vmatprep.subr.bf16.mxu1 %v1048_v10 }
  0x9b   :  { %960 = vmatpush3.bf16.msra.mxu0 %v1127_v55 }
  0x9d   :  { %1051 = vmatpush3.bf16.msra.mxu1 %v1048_v10 }
  0x9e   :  { %647 = vmatmul.mubr.bf16.vlgmr.msra.gmra.mrb[4].mxu0 %v1129_v56  ;;  %1053 = vmatprep.subr.bf16.mxu1 %v1052_v13 }
  0xa1   :  { %1055 = vmatpush3.bf16.msra.mxu1 %v1052_v13 }
  0xa2   :  { %1057 = vmatprep.subr.bf16.mxu1 %v1056_v16 }
  0xa5   :  { %1059 = vmatpush3.bf16.msra.mxu1 %v1056_v16 }
 0x151   :  { %v917_v17 = vpop.f32.mrb[0].mxu0 }
 0x152   :  { %v918_v19 = vpop.f32.mrb[1].mxu0 }
 0x153   :  { %v919_v20 = vadd.f32 %v918_v19, %v917_v17  ;;  %v920_v21 = vpop.f32.mrb[2].mxu0  ;;  %v939_v22 = vpop.f32.mrb[0].mxu1 }
 0x154   :  { %v921_v23 = vpop.f32.mrb[3].mxu0  ;;  %v940_v26 = vpop.f32.mrb[1].mxu1 }
 0x155   :  { %v567_v24 = vadd.f32 %v919_v20, %v842_v18  ;;  %v922_v25 = vadd.f32 %v921_v23, %v920_v21  ;;  %v941_v27 = vadd.f32 %v940_v26, %v939_v22  ;;  %v942_v28 = vpop.f32.mrb[2].mxu1 }
 0x156   :  { %v943_v30 = vpop.f32.mrb[3].mxu1 }
 0x157   :  { %v570_v29 = vadd.f32 %v922_v25, %v842_v18  ;;  %v608_v31 = vadd.f32 %v941_v27, %v567_v24  ;;  %v944_v32 = vadd.f32 %v943_v30, %v942_v28 }
 0x159   :  { %v611_v33 = vadd.f32 %v944_v32, %v570_v29 }
 0x15b   :  { %v689_v34 = vpop.f32.mrb[4].mxu1 }
 0x15c   :  { %v991_v35 = vpop.f32.mrb[5].mxu1 }
 0x15d   :  { %v692_v36 = vpop.f32.mrb[6].mxu1 }
 0x15e   :  { %v992_v37 = vpop.f32.mrb[7].mxu1 }
 0x171   :  { %v961_v38 = vpop.f32.mrb[4].mxu0 }
 0x172   :  { %v962_v39 = vpop.f32.mrb[5].mxu0 }
 0x173   :  { %v963_v40 = vadd.f32 %v962_v39, %v961_v38  ;;  %v964_v41 = vpop.f32.mrb[6].mxu0 }
 0x174   :  { %v965_v42 = vpop.f32.mrb[7].mxu0 }
 0x175   :  { %v649_v43 = vadd.f32 %v963_v40, %v608_v31  ;;  %v966_v44 = vadd.f32 %v965_v42, %v964_v41 }
 0x177   :  { %v690_v45 = vadd.f32 %v689_v34, %v649_v43  ;;  %v652_v46 = vadd.f32 %v966_v44, %v611_v33 }
 0x179   :  { %v696_v47 = vmax.f32 %v690_v45, 0.0  ;;  %v693_v48 = vadd.f32 %v692_v36, %v652_v46 }
 0x17b   :  { %v697_v49 = vmax.f32 %v693_v48, 0.0  ;;  %1025 = vmatprep.mubr.f32.mxu1 %v696_v47 }
 0x17d   :  { %1026 = vmatmul.mubr.f32.vlgmr.msra.gmra.mrb[8].mxu1 %v697_v49 }
 0x250   :  { %v1027_v53 = vpop.f32.mrb[8].mxu1 }
 0x251   :  { %v787_v54 = vpop.f32.mrb[9].mxu1  ;;  %v793_v56 = vadd.f32 %v1027_v53, %v900_v52 }
 0x252   :  { %v788_v55 = vadd.f32 %v900_v52, %v787_v54 }
 0x253   :  { %v800_v58 = vsel %vm798_vm2, %v793_v56, -1e+30 }
 0x254   :  { %v799_v57 = vsel %vm798_vm2, %v788_v55, -1e+30 }
 0x255   :  { %801 = vmax.xlane.f32.xlu0 %v799_v57 }
 0x259   :  { %803 = vmax.xlane.f32.xlu0 %v800_v58 }
 0x2e2   :  { %v802_v59 = vpop.xlane.xlu0 %801 }
 0x2e3   :  { %v805_v60 = vsub.f32 %v799_v57, %v802_v59 }
 0x2e5   :  { %v807_v61 = vmul.f32 1.442695, %v805_v60 }
 0x2e6   :  { %v804_v62 = vpop.xlane.xlu0 %803 }
 0x2e7   :  { %v806_v63 = vsub.f32 %v800_v58, %v804_v62  ;;  %1133 = vpow2.f32 %v807_v61 }
 0x2e9   :  { %v809_v0 = vmul.f32 1.442695, %v806_v63 }
 0x2eb   :  { %1135 = vpow2.f32 %v809_v0 }
 0x2f1   :  { %v1134_v1 = vpop.eup %1133 }
 0x2f2   :  { %811 = vadd.xlane.f32.xlu1 %v1134_v1 }
 0x2f5   :  { %v1136_v2 = vpop.eup %1135 }
 0x2f6   :  { %813 = vadd.xlane.f32.xlu1 %v1136_v2 }
 0x37f   :  { %v812_v3 = vpop.xlane.xlu1 %811 }
 0x380   :  { %1137 = vlog2.f32 %v812_v3 }
 0x383   :  { %v814_v4 = vpop.xlane.xlu1 %813 }
 0x384   :  { %1139 = vlog2.f32 %v814_v4 }
 0x38a   :  { %v1138_v5 = vpop.eup %1137 }
 0x38b   :  { %v816_v6 = vmul.f32 0.6931472, %v1138_v5 }
 0x38d   :  { %v819_v7 = vsub.f32 %v805_v60, %v816_v6 }
 0x38e   :  { %v1140_v8 = vpop.eup %1139 }
 0x38f   :  { %821 = vst [vmem:[#allocation11] sm:$0xff] %v819_v7  ;;  %v818_v9 = vmul.f32 0.6931472, %v1140_v8 }
 0x391   :  { %v820_v10 = vsub.f32 %v806_v63, %v818_v9 }
 0x393   :  { %822 = vst [vmem:[#allocation11 + $0x8] sm:$0xff] %v820_v10 }
 0x394   :  { %1262 = shalt.err (!%p1259_p2)
}
 0x395   :  { %s1263_s11 = scalar_lea.hbm %s1408_s5, 256 }
 0x396   :  { %p1264_p3 = scmp.ne.s32.totalorder %s1408_s5, %s1263_s11  ;;  %p1267_p4 = scmp.lt.u32.totalorder %s1263_s11, %s1408_s5 }
 0x398   :  { %p1269_p5 = pnand %p1267_p4, %p1264_p3 }
 0x39a   :  { %1272 = shalt.err (!%p1269_p5)
}
 0x39b   :  { %834 = dma.vmem_to_hbm [thread:$0]  %s829_s7, 256, %s1408_s5, [#allocation4], %s1285_s1, %s1285_s1, %s1286_s17  }
 0x39c   :  { %1279 = dma.done.wait [#allocation4], 256  }
 0x39d   :  { %1280 = vsyncadd [#allocation4], 4294967040 }
 0x39e   :  { %838 = vsyncpa [#allocation3], 1 }
 0x39f   :  { %839 = vsyncpa [#allocation6], 1 }
 0x3a0   :  { %840 = vsyncpa [#allocation9], 1 }
 0x3a1   :  { %841 = vsyncpa [#allocation4], 1 }

</bundles_post_ra>
